<compile_context>
chip_gen: v6e
topology: v6e:2x2x1
jax: 0.10.0
libtpu: 0.0.40
codegen_flags: <defaults>
</compile_context>

<pallas_src>
import math

import jax
import jax.numpy as jnp
from jax.experimental import pallas as pl
from jax.experimental.pallas import tpu as pltpu

LOG_STD_MIN = -20.0
LOG_STD_MAX = 0.0
_HALF_LOG_2PI = 0.5 * math.log(2.0 * math.pi)


def _round_up(x: int, m: int) -> int:
    return ((x + m - 1) // m) * m


def _actor_kernel(state_ref, w1_ref, b1_ref, whead_ref, bhead_ref, eps_ref,
                  out_ref):
    """All refs are (features, batch_tile): batch rides the 128-wide lane axis."""
    out_dim = eps_ref.shape[0]

    # hidden layer + ReLU: (hidden, TB)
    h = jnp.dot(w1_ref[...], state_ref[...], preferred_element_type=jnp.float32)
    h = jnp.maximum(h + b1_ref[...], 0.0)

    # fused mu / log_std heads: one MXU push -> (2*out_dim, TB)
    heads = jnp.dot(whead_ref[...], h, preferred_element_type=jnp.float32)
    t = jnp.tanh(heads + bhead_ref[...])          # single EUP pass over the slab
    mu = t[:out_dim, :]
    ls = t[out_dim:, :]

    # rescale log_std to [LOG_STD_MIN, LOG_STD_MAX]
    log_std = LOG_STD_MIN + 0.5 * (LOG_STD_MAX - LOG_STD_MIN) * (ls + 1.0)
    std = jnp.exp(log_std)

    # reparameterized sample + tanh squash
    eps = eps_ref[...]
    z = mu + std * eps
    action = jnp.tanh(z)

    # Normal(mu, std).log_prob(z) computed through (z - mu)/std, exactly like
    # torch (NOT the shortcut `eps`: when std*eps underflows against mu the
    # two differ in float32), plus the tanh change-of-variables correction.
    u = (z - mu) / std
    log_prob = (-0.5 * u * u - log_std - _HALF_LOG_2PI
                - jnp.log(1.0 - action * action + 1e-07))
    logp_sum = jnp.sum(log_prob, axis=0, keepdims=True)       # (1, TB) sublane sum

    # packed lane-dense output: rows [0, out_dim) = action, row out_dim = logp
    out_ref[:out_dim, :] = action
    out_ref[out_dim:, :] = logp_sum


def _choose_tiling(batch: int, block_rows: int):
    """Split the batch evenly into lane-dense tiles (multiples of 128 rows).

    Keeps >= 2 (and an even number of) grid steps once the batch is large
    enough so the "parallel" grid axis can shard across v7x's two
    TensorCores, without forcing needless padding on tiny batches.
    """
    num_tiles = pl.cdiv(batch, block_rows)
    if num_tiles == 1 and batch > 256:
        num_tiles = 2
    if num_tiles > 1 and num_tiles % 2 == 1:
        num_tiles += 1
    tb = _round_up(pl.cdiv(batch, num_tiles), 128)
    num_tiles = pl.cdiv(batch, tb)
    if num_tiles > 1 and num_tiles % 2 == 1:
        num_tiles += 1
    return tb, num_tiles, tb * num_tiles


def actor_forward(state, params, eps, *, block_rows: int = 8192):
    """state: (B, in_dim) f32; eps: (B, out_dim) f32 rsample noise.

    params hold PyTorch-oriented weights: w* is (out_features, in_features),
    b* is (out_features, 1).
    """
    B, in_dim = state.shape
    hidden = params["w1"].shape[0]
    out_dim = params["wmu"].shape[0]

    # Fuse the two heads into one weight / bias (done once per call in XLA).
    whead = jnp.concatenate([params["wmu"], params["wls"]], axis=0)   # (2*out, hidden)
    bhead = jnp.concatenate([params["bmu"], params["bls"]], axis=0)   # (2*out, 1)

    TB, num_tiles, B_pad = _choose_tiling(B, block_rows)

    # Batch-on-lane layout: transpose once in the wrapper (layout plumbing so
    # all in-kernel vector work, the reduction and the stores are lane-dense).
    state_t = state.T
    eps_t = eps.T
    if B_pad != B:
        state_t = jnp.pad(state_t, ((0, 0), (0, B_pad - B)))
        eps_t = jnp.pad(eps_t, ((0, 0), (0, B_pad - B)))

    packed_rows = out_dim + 1
    flops = 2 * B_pad * (in_dim * hidden + hidden * 2 * out_dim)
    transcendentals = 5 * B_pad * out_dim          # 2 tanh(heads) + exp + tanh(z) + log
    bytes_accessed = 4 * (B_pad * (in_dim + out_dim + packed_rows)
                          + hidden * (in_dim + 1)
                          + 2 * out_dim * (hidden + 1))

    packed = pl.pallas_call(
        _actor_kernel,
        out_shape=jax.ShapeDtypeStruct((packed_rows, B_pad), jnp.float32),
        grid=(num_tiles,),
        in_specs=[
            pl.BlockSpec((in_dim, TB), lambda i: (0, i)),            # state^T tile
            pl.BlockSpec((hidden, in_dim), lambda i: (0, 0)),        # W1 (resident)
            pl.BlockSpec((hidden, 1), lambda i: (0, 0)),             # b1 (resident)
            pl.BlockSpec((2 * out_dim, hidden), lambda i: (0, 0)),   # fused head W
            pl.BlockSpec((2 * out_dim, 1), lambda i: (0, 0)),        # fused head b
            pl.BlockSpec((out_dim, TB), lambda i: (0, i)),           # eps^T tile
        ],
        out_specs=pl.BlockSpec((packed_rows, TB), lambda i: (0, i)),
        compiler_params=pltpu.CompilerParams(
            dimension_semantics=("parallel",),
            vmem_limit_bytes=32 * 1024 * 1024,
        ),
        cost_estimate=pl.CostEstimate(
            flops=flops,
            transcendentals=transcendentals,
            bytes_accessed=bytes_accessed,
        ),
    )(state_t, params["w1"], params["b1"], whead, bhead, eps_t)

    action = packed[:out_dim, :B].T          # (B, out_dim)
    log_prob = packed[out_dim:, :B].T        # (B, 1)
    return action, log_prob


def init_params(key, in_dim, out_dim, hidden=32):
    """PyTorch-style uniform(-1/sqrt(fan_in), 1/sqrt(fan_in)) init.

    Weights kept in torch orientation (out_features, in_features); biases as
    (out_features, 1) columns (batch-on-lane broadcast inside the kernel).
    """
    ks = jax.random.split(key, 6)

    def lin(kw, kb, fan_in, fan_out):
        bound = 1.0 / jnp.sqrt(jnp.float32(fan_in))
        w = jax.random.uniform(kw, (fan_out, fan_in), jnp.float32, -bound, bound)
        b = jax.random.uniform(kb, (fan_out, 1), jnp.float32, -bound, bound)
        return w, b

    w1, b1 = lin(ks[0], ks[1], in_dim, hidden)
    wmu, bmu = lin(ks[2], ks[3], hidden, out_dim)
    wls, bls = lin(ks[4], ks[5], hidden, out_dim)
    return {"w1": w1, "b1": b1, "wmu": wmu, "bmu": bmu, "wls": wls, "bls": bls}


def _reference(state, params, eps):
    """Pure-JAX reference.

    Same math as the torch module (Linear = W @ x + b, Normal.log_prob via
    (z - mu)/std), evaluated in the kernel's batch-on-lane orientation so the
    float32 rounding of the matmuls matches the kernel's.
    """
    h = jnp.maximum(params["w1"] @ state.T + params["b1"], 0.0)     # (hidden, B)
    mu = jnp.tanh(params["wmu"] @ h + params["bmu"])                # (out, B)
    ls = jnp.tanh(params["wls"] @ h + params["bls"])
    log_std = LOG_STD_MIN + 0.5 * (LOG_STD_MAX - LOG_STD_MIN) * (ls + 1.0)
    std = jnp.exp(log_std)
    z = mu + std * eps.T
    action = jnp.tanh(z)
    u = (z - mu) / std
    lp = (-0.5 * u * u - log_std - _HALF_LOG_2PI
          - jnp.log(1.0 - action * action + 1e-07))
    return action.T, jnp.sum(lp, axis=0, keepdims=True).T


if __name__ == "__main__":
    key = jax.random.PRNGKey(0)
    k_param, k_state, k_eps = jax.random.split(key, 3)

    B, in_dim, out_dim = 2, 16, 4
    params = init_params(k_param, in_dim, out_dim)
    state = jax.random.normal(k_state, (B, in_dim), jnp.float32)
    eps = jax.random.normal(k_eps, (B, out_dim), jnp.float32)   # rsample noise

    action, log_prob = actor_forward(state, params, eps)
    jax.block_until_ready((action, log_prob))

    ref_action, ref_logprob = _reference(state, params, eps)
    assert action.shape == (B, out_dim) and log_prob.shape == (B, 1)
    # Tolerances absorb MXU-vs-XLA float32 matmul rounding differences.
    assert jnp.allclose(action, ref_action, atol=2e-3, rtol=2e-3)
    assert jnp.allclose(log_prob, ref_logprob, atol=5e-2, rtol=5e-3)

    # Also exercise a batch that needs multiple (parallel) grid steps + padding.
    B2 = 1000
    state2 = jax.random.normal(k_state, (B2, in_dim), jnp.float32)
    eps2 = jax.random.normal(k_eps, (B2, out_dim), jnp.float32)
    a2, lp2 = actor_forward(state2, params, eps2)
    jax.block_until_ready((a2, lp2))
    ra2, rlp2 = _reference(state2, params, eps2)
    assert a2.shape == (B2, out_dim) and lp2.shape == (B2, 1)
    assert jnp.allclose(a2, ra2, atol=2e-3, rtol=2e-3)
    assert jnp.allclose(lp2, rlp2, atol=5e-2, rtol=5e-3)

    print("KERNEL_OK")
</pallas_src>

<mosaic_0001>
module attributes {stable_mosaic.version = 11 : i64} {
  func.func @_actor_kernel(%arg0: i32, %arg1: memref<16x128xf32, #tpu.memory_space<vmem>>, %arg2: memref<32x16xf32, #tpu.memory_space<vmem>>, %arg3: memref<32x1xf32, #tpu.memory_space<vmem>>, %arg4: memref<8x32xf32, #tpu.memory_space<vmem>>, %arg5: memref<8x1xf32, #tpu.memory_space<vmem>>, %arg6: memref<4x128xf32, #tpu.memory_space<vmem>>, %arg7: memref<5x128xf32, #tpu.memory_space<vmem>>) attributes {dimension_semantics = [#tpu.dimension_semantics<parallel>], iteration_bounds = array<i64: 1>, scalar_prefetch = 0 : i64, scratch_operands = 0 : i64, tpu.core_type = #tpu.core_type<tc>, window_params = [{transform_indices = @transform_0, window_bounds = array<i64: 16, 128>}, {pipeline_mode = #tpu.pipeline_mode<synchronous>, transform_indices = @transform_1, window_bounds = array<i64: 32, 16>}, {pipeline_mode = #tpu.pipeline_mode<synchronous>, transform_indices = @transform_2, window_bounds = array<i64: 32, 1>}, {pipeline_mode = #tpu.pipeline_mode<synchronous>, transform_indices = @transform_3, window_bounds = array<i64: 8, 32>}, {pipeline_mode = #tpu.pipeline_mode<synchronous>, transform_indices = @transform_4, window_bounds = array<i64: 8, 1>}, {transform_indices = @transform_5, window_bounds = array<i64: 4, 128>}, {transform_indices = @transform_6, window_bounds = array<i64: 5, 128>}]} {
    %c0 = arith.constant 0 : index
    %c0_0 = arith.constant 0 : index
    %0 = vector.load %arg2[%c0, %c0_0] : memref<32x16xf32, #tpu.memory_space<vmem>>, vector<32x16xf32>
    %c0_1 = arith.constant 0 : index
    %c0_2 = arith.constant 0 : index
    %1 = vector.load %arg1[%c0_1, %c0_2] : memref<16x128xf32, #tpu.memory_space<vmem>>, vector<16x128xf32>
    %cst = arith.constant dense<0.000000e+00> : vector<32x128xf32>
    %2 = tpu.matmul %0, %1, %cst {dimension_numbers = #tpu.dot_dimension_numbers<[1], [0], [0], [1], [0, 0, 1, 1], [], []>} : vector<32x16xf32>, vector<16x128xf32>, vector<32x128xf32> -> vector<32x128xf32>
    %c0_3 = arith.constant 0 : index
    %c0_4 = arith.constant 0 : index
    %3 = vector.load %arg3[%c0_3, %c0_4] : memref<32x1xf32, #tpu.memory_space<vmem>>, vector<32x1xf32>
    %4 = vector.broadcast %3 : vector<32x1xf32> to vector<32x128xf32>
    %5 = arith.addf %2, %4 : vector<32x128xf32>
    %cst_5 = arith.constant 0.000000e+00 : f32
    %6 = vector.broadcast %cst_5 : f32 to vector<32x128xf32>
    %7 = arith.maximumf %5, %6 : vector<32x128xf32>
    %c0_6 = arith.constant 0 : index
    %c0_7 = arith.constant 0 : index
    %8 = vector.load %arg4[%c0_6, %c0_7] : memref<8x32xf32, #tpu.memory_space<vmem>>, vector<8x32xf32>
    %cst_8 = arith.constant dense<0.000000e+00> : vector<8x128xf32>
    %9 = tpu.matmul %8, %7, %cst_8 {dimension_numbers = #tpu.dot_dimension_numbers<[1], [0], [0], [1], [0, 0, 1, 1], [], []>} : vector<8x32xf32>, vector<32x128xf32>, vector<8x128xf32> -> vector<8x128xf32>
    %c0_9 = arith.constant 0 : index
    %c0_10 = arith.constant 0 : index
    %10 = vector.load %arg5[%c0_9, %c0_10] : memref<8x1xf32, #tpu.memory_space<vmem>>, vector<8x1xf32>
    %11 = vector.broadcast %10 : vector<8x1xf32> to vector<8x128xf32>
    %12 = arith.addf %9, %11 : vector<8x128xf32>
    %13 = math.tanh %12 : vector<8x128xf32>
    %14 = vector.extract_strided_slice %13 {offsets = [0, 0], sizes = [4, 128], strides = [1, 1]} : vector<8x128xf32> to vector<4x128xf32>
    %15 = vector.extract_strided_slice %13 {offsets = [4, 0], sizes = [4, 128], strides = [1, 1]} : vector<8x128xf32> to vector<4x128xf32>
    %cst_11 = arith.constant 1.000000e+00 : f32
    %16 = vector.broadcast %cst_11 : f32 to vector<4x128xf32>
    %17 = arith.addf %15, %16 : vector<4x128xf32>
    %cst_12 = arith.constant 1.000000e+01 : f32
    %18 = vector.broadcast %cst_12 : f32 to vector<4x128xf32>
    %19 = arith.mulf %18, %17 : vector<4x128xf32>
    %cst_13 = arith.constant -2.000000e+01 : f32
    %20 = vector.broadcast %cst_13 : f32 to vector<4x128xf32>
    %21 = arith.addf %20, %19 : vector<4x128xf32>
    %22 = math.exp %21 : vector<4x128xf32>
    %c0_14 = arith.constant 0 : index
    %c0_15 = arith.constant 0 : index
    %23 = vector.load %arg6[%c0_14, %c0_15] : memref<4x128xf32, #tpu.memory_space<vmem>>, vector<4x128xf32>
    %24 = arith.mulf %22, %23 : vector<4x128xf32>
    %25 = arith.addf %14, %24 : vector<4x128xf32>
    %26 = math.tanh %25 : vector<4x128xf32>
    %27 = arith.subf %25, %14 : vector<4x128xf32>
    %28 = arith.divf %27, %22 : vector<4x128xf32>
    %cst_16 = arith.constant -5.000000e-01 : f32
    %29 = vector.broadcast %cst_16 : f32 to vector<4x128xf32>
    %30 = arith.mulf %29, %28 : vector<4x128xf32>
    %31 = arith.mulf %30, %28 : vector<4x128xf32>
    %32 = arith.subf %31, %21 : vector<4x128xf32>
    %cst_17 = arith.constant 0.918938517 : f32
    %33 = vector.broadcast %cst_17 : f32 to vector<4x128xf32>
    %34 = arith.subf %32, %33 : vector<4x128xf32>
    %35 = arith.mulf %26, %26 : vector<4x128xf32>
    %cst_18 = arith.constant 1.000000e+00 : f32
    %36 = vector.broadcast %cst_18 : f32 to vector<4x128xf32>
    %37 = arith.subf %36, %35 : vector<4x128xf32>
    %cst_19 = arith.constant 1.000000e-07 : f32
    %38 = vector.broadcast %cst_19 : f32 to vector<4x128xf32>
    %39 = arith.addf %37, %38 : vector<4x128xf32>
    %40 = math.log %39 : vector<4x128xf32>
    %41 = arith.subf %34, %40 : vector<4x128xf32>
    %cst_20 = arith.constant dense<0.000000e+00> : vector<128xf32>
    %42 = vector.multi_reduction <add>, %41, %cst_20 [0] : vector<4x128xf32> to vector<128xf32>
    %43 = vector.shape_cast %42 : vector<128xf32> to vector<1x128xf32>
    %c0_21 = arith.constant 0 : index
    %c0_22 = arith.constant 0 : index
    %44 = vector.load %arg7[%c0_21, %c0_22] : memref<5x128xf32, #tpu.memory_space<vmem>>, vector<4x128xf32>
    tpu.vector_store %arg7[%c0_21, %c0_22], %26 {strides = array<i32>} : memref<5x128xf32, #tpu.memory_space<vmem>>, vector<4x128xf32>,
    %c4 = arith.constant 4 : index
    %c0_23 = arith.constant 0 : index
    %45 = vector.load %arg7[%c4, %c0_23] : memref<5x128xf32, #tpu.memory_space<vmem>>, vector<1x128xf32>
    tpu.vector_store %arg7[%c4, %c0_23], %43 {strides = array<i32>} : memref<5x128xf32, #tpu.memory_space<vmem>>, vector<1x128xf32>,
    return
  }
  func.func @transform_0(%arg0: i32) -> (i32, i32) {
    %c0_i32 = arith.constant 0 : i32
    %c0_i32_0 = arith.constant 0 : i32
    return %c0_i32, %arg0 : i32, i32
  }
  func.func @transform_1(%arg0: i32) -> (i32, i32) {
    %c0_i32 = arith.constant 0 : i32
    %c0_i32_0 = arith.constant 0 : i32
    %c0_i32_1 = arith.constant 0 : i32
    return %c0_i32, %c0_i32_0 : i32, i32
  }
  func.func @transform_2(%arg0: i32) -> (i32, i32) {
    %c0_i32 = arith.constant 0 : i32
    %c0_i32_0 = arith.constant 0 : i32
    %c0_i32_1 = arith.constant 0 : i32
    return %c0_i32, %c0_i32_0 : i32, i32
  }
  func.func @transform_3(%arg0: i32) -> (i32, i32) {
    %c0_i32 = arith.constant 0 : i32
    %c0_i32_0 = arith.constant 0 : i32
    %c0_i32_1 = arith.constant 0 : i32
    return %c0_i32, %c0_i32_0 : i32, i32
  }
  func.func @transform_4(%arg0: i32) -> (i32, i32) {
    %c0_i32 = arith.constant 0 : i32
    %c0_i32_0 = arith.constant 0 : i32
    %c0_i32_1 = arith.constant 0 : i32
    return %c0_i32, %c0_i32_0 : i32, i32
  }
  func.func @transform_5(%arg0: i32) -> (i32, i32) {
    %c0_i32 = arith.constant 0 : i32
    %c0_i32_0 = arith.constant 0 : i32
    return %c0_i32, %arg0 : i32, i32
  }
  func.func @transform_6(%arg0: i32) -> (i32, i32) {
    %c0_i32 = arith.constant 0 : i32
    %c0_i32_0 = arith.constant 0 : i32
    return %c0_i32, %arg0 : i32, i32
  }
}

</mosaic_0001>

<bundles_post_ra>
// kernel: tpu_custom_call.1
= control target key start
LH: loop header
LB: loop body
LE: loop exit
PB: predicated region body
PF: predicated region fallthrough
CT: control target
= control target key end

     0   :  { %vm54_vm0 = vcmask 130048   ;;  %v372_v4 = vmov 0   ;;  %s457_s0 = inlined_call_operand.vmem [shape: f32[16,128], index: 0, kind: input, shape index: {}]   ;;  %s458_s1 = inlined_call_operand.vmem [shape: f32[32,16], index: 1, kind: input, shape index: {}]   ;;  %s459_s2 = inlined_call_operand.vmem [shape: f32[32,1], index: 2, kind: input, shape index: {}]   ;;  %s460_s3 = inlined_call_operand.vmem [shape: f32[8,32], index: 3, kind: input, shape index: {}]   ;;  %s461_s4 = inlined_call_operand.vmem [shape: f32[8,1], index: 4, kind: input, shape index: {}]   ;;  %s462_s5 = inlined_call_operand.vmem [shape: f32[4,128], index: 5, kind: input, shape index: {}]   ;;  %s463_s6 = inlined_call_operand.hbm [shape: f32[5,128], index: 6, kind: output, shape index: {}]  }
   0x1   :  { %v29_v0 = vld [vmem:[%s457_s0 + $0x8] sm:$0xff]  ;;  %v28_v1 = vld [vmem:[%s457_s0] sm:$0xff]  ;;  %338 = vset.pattern.permute.xlu0 %v372_v4  ;;  %v33_v5 = vld [vmem:[%s459_s2 + $0x18] sm:$0xff] }
   0x2   :  { %v24_v2 = vld [vmem:[%s458_s1] sm:$0xff]  ;;  %313 = vmatprep.subr.mxu0 %v29_v0  ;;  %v25_v3 = vld [vmem:[%s458_s1 + $0x8] sm:$0xff]  ;;  %v26_v7 = vld [vmem:[%s458_s1 + $0x10] sm:$0xff]  ;;  %51 = vperm.xlu0 %338, %v33_v5  }
   0x3   :  { %317 = vmatprep.mubr.msk.f32.mxu0 %vm54_vm0, %v24_v2  ;;  %314 = vmatpush3.msra.mxu0 %v29_v0  ;;  %v31_v6 = vld [vmem:[%s459_s2 + $0x8] sm:$0xff] }
   0x4   :  { %315 = vmatprep.subr.mxu0 %v28_v1 }
   0x5   :  { %11 = vsyncpa [#allocation3], 0  ;;  %316 = vmatpush3.msra.mxu0 %v28_v1  ;;  %339 = vset.pattern.permute.xlu1 %v372_v4  ;;  %v32_v8 = vld [vmem:[%s459_s2 + $0x10] sm:$0xff]  ;;  %v27_v9 = vld [vmem:[%s458_s1 + $0x18] sm:$0xff]  ;;  %v373_v12 = vmov 0.0   ;;  %vm374_vm1 = vmmov 0  }
   0x6   :  { %318 = vmatmul.mubr.msk.f32.vlgmr.msra.gmra.mxu0 %vm54_vm0, %v25_v3  ;;  %41 = vperm.xlu1 %339, %v31_v6   ;;  %v30_v10 = vld [vmem:[%s459_s2] sm:$0xff]  ;;  %vm163_vm2 = vcmask 261120   ;;  %vm272_vm3 = vcmask 1043456  }
   0x7   :  { %320 = vmatprep.mubr.msk.f32.mxu0 %vm54_vm0, %v26_v7  ;;  %46 = vperm.xlu0 %338, %v32_v8   ;;  %v157_v11 = vld [vmem:[%s461_s4] sm:$0xff] }
   0x8   :  { %323 = vmatprep.subr.mxu1 %v373_v12  ;;  %331 = vmatprep.mubr.msk.f32.mxu1 %vm374_vm1, %v373_v12  ;;  %v156_v29 = vld [vmem:[%s460_s3] sm:$0xff]  ;;  %s375_s3 = smov [#allocation2]  }
   0x9   :  { %v243_v39 = vld [vmem:[%s462_s5] sm:$0xf]  ;;  %s288_s5 = sshll.u32 %s375_s3, 4  ;;  %s289_s5 = int_to_ptr.vmem [resolvable:$true] %s288_s5 }
   0xa   :  { %321 = vmatmul.mubr.msk.f32.gmra.mxu0 %vm54_vm0, %v27_v9  ;;  %36 = vperm.xlu1 %339, %v30_v10   ;;  %v245_v40 = vrot.slane %v243_v39, 4  ;;  %s350_s19 = scalar_lea.vmem %s289_s5, 128  ;;  %p355_p1 = scmp.lt.s32.totalorder %s289_s5, %s289_s5 }
   0xb   :  { %160 = vperm.xlu0 %338, %v157_v11   ;;  %p351_p0 = scmp.ne.s32.totalorder %s289_s5, %s350_s19  ;;  %p356_p2 = scmp.lt.s32.totalorder %s350_s19, %s350_s19 }
   0xd   :  { %p357_p3 = por %p356_p2, %p355_p1 }
   0xf   :  { %p358_p4 = pnand %p357_p3, %p351_p0 }
  0x7d   :  { %v52_v13 = vpop.permute.xlu0 %51 }
  0x81   :  { %v42_v14 = vpop.permute.xlu1 %41 }
  0x82   :  { %v47_v18 = vpop.permute.xlu0 %46 }
  0x85   :  { %v37_v20 = vpop.permute.xlu1 %36 }
  0x86   :  { %v161_v30 = vpop.permute.xlu0 %160 }
  0xc6   :  { %v319_v15 = vpop.f32.mrf.mxu0 }
  0xc7   :  { %v139_v22 = vadd.f32 %v319_v15, %v42_v14 }
  0xc8   :  { %v133_v16 = vpop.f32.mrf.mxu0 }
  0xc9   :  { %v134_v25 = vadd.f32 %v133_v16, %v37_v20  ;;  %v153_v27 = vmax.f32 %v139_v22, 0.0 }
  0xca   :  { %v322_v17 = vpop.f32.mrf.mxu0 }
  0xcb   :  { %v149_v19 = vadd.f32 %v322_v17, %v52_v13  ;;  %v152_v28 = vmax.f32 %v134_v25, 0.0 }
  0xcc   :  { %v143_v21 = vpop.f32.mrf.mxu0 }
  0xcd   :  { %v155_v23 = vmax.f32 %v149_v19, 0.0  ;;  %v144_v24 = vadd.f32 %v143_v21, %v47_v18 }
  0xcf   :  { %v154_v26 = vmax.f32 %v144_v24, 0.0  ;;  %324 = vmatpush3.msra.mxu1 %v155_v23 }
  0xd0   :  { %325 = vmatprep.subr.mxu1 %v373_v12 }
  0xd1   :  { %326 = vmatpush3.msra.mxu1 %v154_v26 }
  0xd2   :  { %327 = vmatprep.subr.mxu1 %v373_v12 }
  0xd3   :  { %328 = vmatpush3.msra.mxu1 %v153_v27 }
  0xd4   :  { %329 = vmatprep.subr.mxu1 %v373_v12 }
  0xd5   :  { %330 = vmatpush3.msra.mxu1 %v152_v28 }
  0xd6   :  { %332 = vmatmul.mubr.msk.f32.vlgmr.msra.gmra.mxu1 %vm163_vm2, %v156_v29 }
 0x196   :  { %v233_v31 = vpop.f32.mrf.mxu1 }
 0x197   :  { %v234_v32 = vadd.f32 %v233_v31, %v161_v30 }
 0x198   :  { %v333_v33 = vpop.f32.mrf.mxu1 }
 0x199   :  { %340 = vtanh.f32 %v234_v32 }
 0x1a6   :  { %v341_v34 = vpop.eup %340 }
 0x1a7   :  { %v238_v35 = vadd.f32 1.0, %v341_v34 }
 0x1a9   :  { %v239_v36 = vmul.f32 10.0, %v238_v35 }
 0x1ab   :  { %v240_v37 = vadd.f32 -20.0, %v239_v36 }
 0x1ad   :  { %v241_v38 = vmul.f32 1.442695, %v240_v37  ;;  %v262_v55 = vrot.slane %v240_v37, 4 }
 0x1af   :  { %342 = vpow2.f32 %v241_v38 }
 0x1bc   :  { %v343_v41 = vpop.eup %342 }
 0x1bd   :  { %v247_v42 = vmul.f32 %v343_v41, %v245_v40  ;;  %v255_v45 = vrot.slane %v343_v41, 4 }
 0x1bf   :  { %v249_v43 = vrot.slane %v247_v42, 4 }
 0x1c1   :  { %v251_v44 = vadd.f32 %v341_v34, %v249_v43 }
 0x1c3   :  { %344 = vtanh.f32 %v251_v44  ;;  %v253_v49 = vsub.f32 %v251_v44, %v341_v34 }
 0x1c4   :  { %346 = vrcp.f32 %v255_v45 }
 0x1d0   :  { %v345_v46 = vpop.eup %344 }
 0x1d1   :  { %v266_v47 = vmul.f32 %v345_v46, %v345_v46  ;;  %280 = vst [vmem:[#allocation2] sm:$0xf] %v345_v46  ;;  %v347_v48 = vpop.eup %346 }
 0x1d2   :  { %v258_v51 = vmul.f32 %v347_v48, %v253_v49 }
 0x1d3   :  { %v267_v50 = vsub.f32 1.0, %v266_v47 }
 0x1d4   :  { %v259_v53 = vmul.f32 -0.5, %v258_v51 }
 0x1d5   :  { %v268_v52 = vadd.f32 1e-07, %v267_v50 }
 0x1d6   :  { %v260_v54 = vmul.f32 %v259_v53, %v258_v51 }
 0x1d7   :  { %348 = vlog2.f32 %v268_v52 }
 0x1d8   :  { %v264_v56 = vsub.f32 %v260_v54, %v262_v55 }
 0x1da   :  { %v301_v58 = vadd.f32 -0.9189385, %v264_v56 }
 0x1e4   :  { %v349_v57 = vpop.eup %348 }
 0x1e5   :  { %v270_v59 = vmul.f32 0.6931472, %v349_v57 }
 0x1e7   :  { %v271_v60 = vsub.f32 %v301_v58, %v270_v59 }
 0x1e9   :  { %v273_v61 = vsel %vm272_vm3, %v271_v60, 0.0 }
 0x1ea   :  { %v274_v62 = vrot.slane %v273_v61, 4 }
 0x1ec   :  { %v275_v63 = vadd.f32 %v274_v62, %v273_v61 }
 0x1ee   :  { %v276_v0 = vrot.slane %v275_v63, 2 }
 0x1f0   :  { %v277_v1 = vadd.f32 %v276_v0, %v275_v63 }
 0x1f2   :  { %v278_v2 = vrot.slane %v277_v1, 1 }
 0x1f4   :  { %v279_v3 = vadd.f32 %v278_v2, %v277_v1 }
 0x1f6   :  { %281 = vst [vmem:[#allocation2 + $0x4] sm:$0x1] %v279_v3 }
 0x1f7   :  { %361 = shalt.err (!%p358_p4)
}
 0x1f8   :  { %291 = dma.vmem_to_hbm [thread:$0]  %s289_s5, 128, %s463_s6, [#allocation3]  }
 0x1f9   :  { %370 = dma.done.wait [#allocation3], 128  }
 0x1fa   :  { %371 = vsyncadd [#allocation3], 4294967168 }
 0x1fb   :  { %295 = vsyncpa [#allocation3], 1 }

</bundles_post_ra>
